<compile_context>
chip_gen: v7x
topology: tpu7x:2x2x1
jax: 0.10.0
libtpu: 0.0.40
codegen_flags: <defaults>
</compile_context>

<pallas_src>
import functools

import jax
import jax.numpy as jnp
from jax.experimental import pallas as pl
from jax.experimental.pallas import tpu as pltpu


def _vmem_capacity_bytes():
    """Physical VMEM per core, with a conservative (v7x-sized) fallback."""
    try:
        info = pltpu.get_tpu_info()
        for attr in ("vmem_capacity_bytes", "vmem_size_bytes", "vmem_bytes"):
            v = getattr(info, attr, None)
            if v:
                return int(v)
    except Exception:
        pass
    return 64 * 1024 * 1024


def _choose_tiles(N, C, S, itemsize, vmem_limit, max_nb=None, max_ts=None):
    """Pick (nb, ts): batch tile (divisor of N) and lane-aligned spatial tile."""
    budget = int(vmem_limit * 0.8)
    base_ts = S if S < 128 else 128
    # Batch tile: largest divisor of N whose pass-2 peak (~4x tile) fits.
    cap_nb = N if max_nb is None else max(1, min(N, max_nb))
    nb = 1
    for d in range(cap_nb, 0, -1):
        if N % d == 0 and 4 * d * C * base_ts * itemsize <= budget:
            nb = d
            break
    if S < 128:
        return nb, S                    # full-extent spatial block (always legal)
    # Spatial tile: largest multiple of 128 keeping both passes under budget.
    per128_in = nb * C * 128 * itemsize          # one input-stream buffer slice
    per128_acc = C * 128 * 4                     # f32 lane-partial accumulator
    k1 = budget // max(1, 2 * per128_in + per128_acc)   # pass 1: 2x in + acc
    k2 = budget // max(1, 4 * per128_in)                 # pass 2: 2x in + 2x out
    ts_cap = (S // 128) * 128
    if max_ts is not None:
        ts_cap = min(ts_cap, max(128, (max_ts // 128) * 128))
    k = max(1, min(k1, k2, ts_cap // 128))
    return nb, 128 * k


def _bn_stats_kernel(x_ref, psum_ref, acc_ref, *, S, ts, t_chunk):
    """Per-chunk, per-channel (sum, sum-of-squares) over batch & spatial."""
    c = pl.program_id(0)            # chunk          ("parallel", v7x megacore)
    b = pl.program_id(1)            # batch tile     ("arbitrary", reduced)
    t = pl.program_id(2)            # spatial tile   ("arbitrary", reduced)

    @pl.when(jnp.logical_and(b == 0, t == 0))
    def _init():
        acc_ref[...] = jnp.zeros_like(acc_ref)

    x = x_ref[...].astype(jnp.float32)                       # (nb, C, ts)
    # Mask the ragged lanes of the global last spatial tile (no-op elsewhere).
    offset = (c * t_chunk + t) * ts
    lane = jax.lax.broadcasted_iota(jnp.int32, (1, 1, ts), 2)
    x = jnp.where(lane < (S - offset), x, 0.0)
    # Batch reduce first (pure VALU); the XLU lane reduce is deferred to finalize.
    acc_ref[0] += jnp.sum(x, axis=0)                          # (C, ts)
    acc_ref[1] += jnp.sum(x * x, axis=0)                      # (C, ts)

    @pl.when(jnp.logical_and(b == pl.num_programs(1) - 1,
                             t == pl.num_programs(2) - 1))
    def _emit():
        psum_ref[0, 0, :, :] = jnp.sum(acc_ref[0], axis=-1, keepdims=True)  # (C,1)
        psum_ref[0, 1, :, :] = jnp.sum(acc_ref[1], axis=-1, keepdims=True)  # (C,1)


def _bn_apply_kernel(sb_ref, x_ref, o_ref):
    """y = x * scale + bias (per-channel), computed in f32, cast to out dtype."""
    x = x_ref[...].astype(jnp.float32)                        # (nb, C, ts)
    scale = sb_ref[0][None, :, :]                             # (1, C, 1)
    bias = sb_ref[1][None, :, :]                              # (1, C, 1)
    o_ref[...] = (x * scale + bias).astype(o_ref.dtype)


def fixed_batchnorm2d(x, num_features=None, eps=0.01, max_nb=None, max_ts=None):
    """Pallas TPU forward of FixedBatchNorm2d on an NCHW tensor."""
    N, C, H, W = x.shape
    if num_features is not None:
        assert C == num_features, f"input has {C} channels, expected {num_features}"
    S = H * W
    xr = x.reshape(N, C, S)                      # NCHW-native view, no transpose
    itemsize = x.dtype.itemsize

    vmem_cap = _vmem_capacity_bytes()
    vmem_limit = max(32 << 20, min(vmem_cap * 3 // 4, 96 << 20))
    nb, ts = _choose_tiles(N, C, S, itemsize, vmem_limit, max_nb, max_ts)

    NB = N // nb
    T = -(-S // ts)                              # total spatial tiles (ceil div)
    n_chunks = 2 if (T >= 2 and T % 2 == 0) else 1
    t_chunk = T // n_chunks

    def x_stats_map(c, b, t):
        return (b, 0, c * t_chunk + t)

    def psum_map(c, b, t):
        return (c, 0, 0, 0)

    # ---- pass 1: per-chunk per-channel (sum, sumsq) -----------------------------
    psums = pl.pallas_call(
        functools.partial(_bn_stats_kernel, S=S, ts=ts, t_chunk=t_chunk),
        out_shape=jax.ShapeDtypeStruct((n_chunks, 2, C, 1), jnp.float32),
        grid=(n_chunks, NB, t_chunk),
        in_specs=[pl.BlockSpec((nb, C, ts), x_stats_map)],
        out_specs=pl.BlockSpec((1, 2, C, 1), psum_map),
        scratch_shapes=[pltpu.VMEM((2, C, ts), jnp.float32)],
        compiler_params=pltpu.CompilerParams(
            dimension_semantics=("parallel", "arbitrary", "arbitrary"),
            vmem_limit_bytes=vmem_limit),
    )(xr)

    # ---- tiny plain-JAX epilogue: combine chunks -> per-channel scale / bias ----
    sums = jnp.sum(psums, axis=0)                         # (2, C, 1)
    inv_count = 1.0 / float(N * S)
    mean = sums[0] * inv_count
    var = jnp.maximum(sums[1] * inv_count - mean * mean, 0.0)   # biased, clamped
    # TODO(synk): E[x^2]-E[x]^2 in f32 can lose precision when |mean| >> std;
    # a shifted / two-pass variance would track PyTorch more tightly there.
    scale = jax.lax.rsqrt(var + float(eps))
    sb = jnp.stack([scale, -mean * scale])                # (2, C, 1) f32

    # ---- pass 2: normalize (independent tiles -> megacore-shardable) ------------
    out = pl.pallas_call(
        _bn_apply_kernel,
        out_shape=jax.ShapeDtypeStruct((N, C, S), x.dtype),
        grid=(NB, T),
        in_specs=[pl.BlockSpec((2, C, 1), lambda b, t: (0, 0, 0)),
                  pl.BlockSpec((nb, C, ts), lambda b, t: (b, 0, t))],
        out_specs=pl.BlockSpec((nb, C, ts), lambda b, t: (b, 0, t)),
        compiler_params=pltpu.CompilerParams(
            dimension_semantics=("parallel", "parallel"),
            vmem_limit_bytes=vmem_limit),
    )(sb, xr)

    return out.reshape(N, C, H, W)


def reference_nchw(x, eps=0.01):
    """Pure-JAX reference mirroring the PyTorch forward exactly (in f32)."""
    x = x.astype(jnp.float32)
    mean = jnp.mean(x, axis=(0, 2, 3), keepdims=True)
    var = jnp.mean((x - mean) ** 2, axis=(0, 2, 3), keepdims=True)  # unbiased=False
    return (x - mean) * jax.lax.rsqrt(var + eps)


if __name__ == "__main__":
    key = jax.random.PRNGKey(0)
    k1, k2, k3 = jax.random.split(key, 3)
    EPS = 0.01

    # Case 1: canonical small shape; force 128-lane tiles and nb=1 so the
    # chunk-parallel / batch-accumulate / init-finalize paths are exercised.
    x1 = jax.random.normal(k1, (2, 4, 16, 16), jnp.float32) * 2.0 + 0.5
    o1 = jax.block_until_ready(
        fixed_batchnorm2d(x1, num_features=4, eps=EPS, max_nb=1, max_ts=128))
    r1 = reference_nchw(x1, EPS)
    assert o1.shape == x1.shape
    e1 = float(jnp.max(jnp.abs(o1 - r1)))
    assert jnp.allclose(o1, r1, rtol=2e-4, atol=2e-4), e1

    # Case 2: H*W = 144 (not a multiple of 128) -> ragged last spatial tile,
    # exercises the iota mask in pass 1 and the partial output block in pass 2.
    x2 = jax.random.normal(k2, (2, 8, 12, 12), jnp.float32)
    o2 = jax.block_until_ready(fixed_batchnorm2d(x2, num_features=8, eps=EPS))
    r2 = reference_nchw(x2, EPS)
    e2 = float(jnp.max(jnp.abs(o2 - r2)))
    assert jnp.allclose(o2, r2, rtol=2e-4, atol=2e-4), e2

    # Case 3: bf16 input, S < 128 -> full-extent spatial block + dtype cast path.
    x3 = jax.random.normal(k3, (2, 8, 8, 8), jnp.float32).astype(jnp.bfloat16)
    o3 = jax.block_until_ready(fixed_batchnorm2d(x3, num_features=8, eps=EPS))
    r3 = reference_nchw(x3, EPS)
    e3 = float(jnp.max(jnp.abs(o3.astype(jnp.float32) - r3)))
    assert jnp.allclose(o3.astype(jnp.float32), r3, rtol=5e-2, atol=5e-2), e3

    print("KERNEL_OK")
</pallas_src>

<mosaic_0001>
module attributes {stable_mosaic.version = 11 : i64} {
  func.func @_bn_stats_kernel(%arg0: i32, %arg1: i32, %arg2: i32, %arg3: memref<1x4x128xf32, #tpu.memory_space<vmem>>, %arg4: memref<1x2x4x1xf32, #tpu.memory_space<vmem>>, %arg5: memref<2x4x128xf32, #tpu.memory_space<vmem>>) attributes {dimension_semantics = [#tpu.dimension_semantics<parallel>, #tpu.dimension_semantics<arbitrary>, #tpu.dimension_semantics<arbitrary>], iteration_bounds = array<i64: 2, 2, 1>, scalar_prefetch = 0 : i64, scratch_operands = 1 : i64, tpu.core_type = #tpu.core_type<tc>, window_params = [{transform_indices = @transform_0, window_bounds = array<i64: 1, 4, 128>}, {transform_indices = @transform_1, window_bounds = array<i64: 1, 2, 4, 1>}]} {
    %c0_i32 = arith.constant 0 : i32
    %0 = arith.cmpi eq, %arg1, %c0_i32 : i32
    %c0_i32_0 = arith.constant 0 : i32
    %1 = arith.cmpi eq, %arg2, %c0_i32_0 : i32
    %2 = arith.andi %0, %1 : i1
    %3 = arith.extui %2 : i1 to i32
    %c0_i32_1 = arith.constant 0 : i32
    %4 = arith.cmpi ne, %3, %c0_i32_1 : i32
    scf.if %4 {
      %cst_20 = arith.constant 0.000000e+00 : f32
      %37 = vector.broadcast %cst_20 : f32 to vector<2x4x128xf32>
      %c0_21 = arith.constant 0 : index
      %c0_22 = arith.constant 0 : index
      %c0_23 = arith.constant 0 : index
      %38 = vector.load %arg5[%c0_21, %c0_22, %c0_23] : memref<2x4x128xf32, #tpu.memory_space<vmem>>, vector<2x4x128xf32>
      tpu.vector_store %arg5[%c0_21, %c0_22, %c0_23], %37 {strides = array<i32>} : memref<2x4x128xf32, #tpu.memory_space<vmem>>, vector<2x4x128xf32>,
    } else {
    }
    %c0 = arith.constant 0 : index
    %c0_2 = arith.constant 0 : index
    %c0_3 = arith.constant 0 : index
    %5 = vector.load %arg3[%c0, %c0_2, %c0_3] : memref<1x4x128xf32, #tpu.memory_space<vmem>>, vector<1x4x128xf32>
    %c1_i32 = arith.constant 1 : i32
    %6 = arith.muli %arg0, %c1_i32 : i32
    %7 = arith.addi %6, %arg2 : i32
    %c128_i32 = arith.constant 128 : i32
    %8 = arith.muli %7, %c128_i32 : i32
    %9 = tpu.iota {dimensions = array<i32: 2>} : vector<1x1x128xi32>
    %c256_i32 = arith.constant 256 : i32
    %10 = arith.subi %c256_i32, %8 : i32
    %11 = vector.broadcast %10 : i32 to vector<1x1x128xi32>
    %12 = arith.cmpi slt, %9, %11 : vector<1x1x128xi32>
    %cst = arith.constant 0.000000e+00 : f32
    %13 = vector.shape_cast %12 : vector<1x1x128xi1> to vector<1x1x128xi1>
    %14 = vector.broadcast %13 : vector<1x1x128xi1> to vector<1x4x128xi1>
    %15 = vector.broadcast %cst : f32 to vector<1x4x128xf32>
    %16 = arith.select %14, %5, %15 : vector<1x4x128xi1>, vector<1x4x128xf32>
    %c0_4 = arith.constant 0 : index
    %c0_5 = arith.constant 0 : index
    %c0_6 = arith.constant 0 : index
    %17 = vector.load %arg5[%c0_4, %c0_5, %c0_6] : memref<2x4x128xf32, #tpu.memory_space<vmem>>, vector<1x4x128xf32>
    %18 = vector.shape_cast %17 : vector<1x4x128xf32> to vector<4x128xf32>
    %cst_7 = arith.constant dense<0.000000e+00> : vector<4x128xf32>
    %19 = vector.multi_reduction <add>, %16, %cst_7 [0] : vector<1x4x128xf32> to vector<4x128xf32>
    %20 = arith.addf %18, %19 : vector<4x128xf32>
    %c0_8 = arith.constant 0 : index
    %c0_9 = arith.constant 0 : index
    %c0_10 = arith.constant 0 : index
    %21 = vector.load %arg5[%c0_8, %c0_9, %c0_10] : memref<2x4x128xf32, #tpu.memory_space<vmem>>, vector<1x4x128xf32>
    %22 = vector.shape_cast %21 : vector<1x4x128xf32> to vector<4x128xf32>
    %23 = vector.shape_cast %20 : vector<4x128xf32> to vector<1x4x128xf32>
    tpu.vector_store %arg5[%c0_8, %c0_9, %c0_10], %23 {strides = array<i32>} : memref<2x4x128xf32, #tpu.memory_space<vmem>>, vector<1x4x128xf32>,
    %c1 = arith.constant 1 : index
    %c0_11 = arith.constant 0 : index
    %c0_12 = arith.constant 0 : index
    %24 = vector.load %arg5[%c1, %c0_11, %c0_12] : memref<2x4x128xf32, #tpu.memory_space<vmem>>, vector<1x4x128xf32>
    %25 = vector.shape_cast %24 : vector<1x4x128xf32> to vector<4x128xf32>
    %26 = arith.mulf %16, %16 : vector<1x4x128xf32>
    %cst_13 = arith.constant dense<0.000000e+00> : vector<4x128xf32>
    %27 = vector.multi_reduction <add>, %26, %cst_13 [0] : vector<1x4x128xf32> to vector<4x128xf32>
    %28 = arith.addf %25, %27 : vector<4x128xf32>
    %c1_14 = arith.constant 1 : index
    %c0_15 = arith.constant 0 : index
    %c0_16 = arith.constant 0 : index
    %29 = vector.load %arg5[%c1_14, %c0_15, %c0_16] : memref<2x4x128xf32, #tpu.memory_space<vmem>>, vector<1x4x128xf32>
    %30 = vector.shape_cast %29 : vector<1x4x128xf32> to vector<4x128xf32>
    %31 = vector.shape_cast %28 : vector<4x128xf32> to vector<1x4x128xf32>
    tpu.vector_store %arg5[%c1_14, %c0_15, %c0_16], %31 {strides = array<i32>} : memref<2x4x128xf32, #tpu.memory_space<vmem>>, vector<1x4x128xf32>,
    %c1_i32_17 = arith.constant 1 : i32
    %32 = arith.cmpi eq, %arg1, %c1_i32_17 : i32
    %c0_i32_18 = arith.constant 0 : i32
    %33 = arith.cmpi eq, %arg2, %c0_i32_18 : i32
    %34 = arith.andi %32, %33 : i1
    %35 = arith.extui %34 : i1 to i32
    %c0_i32_19 = arith.constant 0 : i32
    %36 = arith.cmpi ne, %35, %c0_i32_19 : i32
    scf.if %36 {
      %c0_20 = arith.constant 0 : index
      %c0_21 = arith.constant 0 : index
      %c0_22 = arith.constant 0 : index
      %37 = vector.load %arg5[%c0_20, %c0_21, %c0_22] : memref<2x4x128xf32, #tpu.memory_space<vmem>>, vector<1x4x128xf32>
      %38 = vector.shape_cast %37 : vector<1x4x128xf32> to vector<4x128xf32>
      %cst_23 = arith.constant dense<0.000000e+00> : vector<4xf32>
      %39 = vector.multi_reduction <add>, %38, %cst_23 [1] : vector<4x128xf32> to vector<4xf32>
      %40 = vector.shape_cast %39 : vector<4xf32> to vector<4x1xf32>
      %c0_24 = arith.constant 0 : index
      %c0_25 = arith.constant 0 : index
      %c0_26 = arith.constant 0 : index
      %c0_27 = arith.constant 0 : index
      %41 = vector.load %arg4[%c0_24, %c0_25, %c0_26, %c0_27] : memref<1x2x4x1xf32, #tpu.memory_space<vmem>>, vector<1x1x4x1xf32>
      %42 = vector.shape_cast %41 : vector<1x1x4x1xf32> to vector<4x1xf32>
      %43 = vector.shape_cast %40 : vector<4x1xf32> to vector<1x1x4x1xf32>
      tpu.vector_store %arg4[%c0_24, %c0_25, %c0_26, %c0_27], %43 {strides = array<i32>} : memref<1x2x4x1xf32, #tpu.memory_space<vmem>>, vector<1x1x4x1xf32>,
      %c1_28 = arith.constant 1 : index
      %c0_29 = arith.constant 0 : index
      %c0_30 = arith.constant 0 : index
      %44 = vector.load %arg5[%c1_28, %c0_29, %c0_30] : memref<2x4x128xf32, #tpu.memory_space<vmem>>, vector<1x4x128xf32>
      %45 = vector.shape_cast %44 : vector<1x4x128xf32> to vector<4x128xf32>
      %cst_31 = arith.constant dense<0.000000e+00> : vector<4xf32>
      %46 = vector.multi_reduction <add>, %45, %cst_31 [1] : vector<4x128xf32> to vector<4xf32>
      %47 = vector.shape_cast %46 : vector<4xf32> to vector<4x1xf32>
      %c0_32 = arith.constant 0 : index
      %c1_33 = arith.constant 1 : index
      %c0_34 = arith.constant 0 : index
      %c0_35 = arith.constant 0 : index
      %48 = vector.load %arg4[%c0_32, %c1_33, %c0_34, %c0_35] : memref<1x2x4x1xf32, #tpu.memory_space<vmem>>, vector<1x1x4x1xf32>
      %49 = vector.shape_cast %48 : vector<1x1x4x1xf32> to vector<4x1xf32>
      %50 = vector.shape_cast %47 : vector<4x1xf32> to vector<1x1x4x1xf32>
      tpu.vector_store %arg4[%c0_32, %c1_33, %c0_34, %c0_35], %50 {strides = array<i32>} : memref<1x2x4x1xf32, #tpu.memory_space<vmem>>, vector<1x1x4x1xf32>,
    } else {
    }
    return
  }
  func.func @transform_0(%arg0: i32, %arg1: i32, %arg2: i32) -> (i32, i32, i32) {
    %c1_i32 = arith.constant 1 : i32
    %0 = arith.muli %arg0, %c1_i32 : i32
    %1 = arith.addi %0, %arg2 : i32
    %c0_i32 = arith.constant 0 : i32
    %c0_i32_0 = arith.constant 0 : i32
    return %arg1, %c0_i32, %1 : i32, i32, i32
  }
  func.func @transform_1(%arg0: i32, %arg1: i32, %arg2: i32) -> (i32, i32, i32, i32) {
    %c0_i32 = arith.constant 0 : i32
    %c0_i32_0 = arith.constant 0 : i32
    %c0_i32_1 = arith.constant 0 : i32
    %c0_i32_2 = arith.constant 0 : i32
    return %arg0, %c0_i32, %c0_i32_0, %c0_i32_1 : i32, i32, i32, i32
  }
}

</mosaic_0001>

<bundles_post_ra>
// kernel: tpu_custom_call.1
= control target key start
LH: loop header
LB: loop body
LE: loop exit
PB: predicated region body
PF: predicated region fallthrough
CT: control target
= control target key end

     0   :  { %6 = vsyncpa [#allocation4], 0  ;;  %s653_s0 = inlined_call_operand.hbm [shape: f32[2,4,256], index: 0, kind: input, shape index: {}]   ;;  %s654_s1 = inlined_call_operand.vmem [shape: f32[2,2,4,1], index: 1, kind: output, shape index: {}]  }
   0x1   :  { %8 = vsyncpa [#allocation4 + $0x1], 0  ;;  %s494_s6 = smov 0   ;;  %s496_s7 = smov 0  }
   0x2   :  { %s498_s8 = smov 0   ;;  %s500_s9 = smov 0  }
   0x3   :  { %s502_s10 = smov 0   ;;  %s504_s11 = smov 0  }
   0x4   :  { %s506_s12 = smov 0   ;;  %s508_s13 = smov 0  }
   0x5 LB: > { %s292_s14 = sadd.s32 4294967295, %s480_s13   ;;  %s29_s15 = sadd.s32 1, %s472_s11  ;;  %s480_s13 = sphi %s508_s13, %s14_s13   ;;  %s476_s12 = sphi %s506_s12, %s666_s12   ;;  %s472_s11 = sphi %s504_s11, %s665_s11   ;;  %s468_s10 = sphi %s502_s10, %s664_s10   ;;  %s464_s9 = sphi %s500_s9, %s663_s9   ;;  %s460_s8 = sphi %s498_s8, %s662_s8   ;;  %s456_s7 = sphi %s496_s7, %s661_s7   ;;  %s452_s6 = sphi %s494_s6, %s660_s6  }
   0x6   : > { %p31_p0 = scmp.ge.s32.totalorder %s29_s15, 2  ;;  %s33_s16 = sadd.s32 1, %s476_s12 }
   0x7   : > { %s44_s17 = sadd.s32 1, %s460_s8  ;;  %p51_p1 = scmp.ne.s32.totalorder %s460_s8, %s456_s7 }
   0x8   : > { %s668_s15 = smov (%p31_p0, %s29_s15), 0  ;;  %s670_s16 = smov (!%p31_p0, %s33_s16), %s476_s12 }
   0x9   : > { %s39_s18 = ssub.s32 %s472_s11, %s668_s15  ;;  %p52_p2 = scmp.eq.s32.totalorder %s480_s13, 0 }
   0xa   : > { %p35_p3 = scmp.ge.s32.totalorder %s670_s16, 2  ;;  %p57_p4 = scmp.ne.s32.totalorder %s456_s7, %s452_s6 }
   0xb   : > { %p545_p5 = por %p52_p2, %p51_p1  ;;  %p58_p6 = scmp.eq.s32.totalorder %s292_s14, 0 }
   0xc   : > { %s672_s16 = smov (%p35_p3, %s670_s16), 0  ;;  %p318_p8 = scmp.lt.s32.totalorder %s480_s13, 4 }
   0xd   : > { %p551_p7 = por %p58_p6, %p57_p4  ;;  %s40_s21 = ssub.s32 %s476_s12, %s672_s16 }
   0xe   : > { %s41_s22 = sor.u32 %s40_s21, %s39_s18  ;;  %s107_s23 = sand.u32 1, %s460_s8  }
   0xf   : > { %p42_p9 = scmp.eq.s32.totalorder %s41_s22, 0  ;;  %s296_s24 = sshll.u32 %s107_s23, 2 }
  0x10   : > { %s297_s25 = sshll.u32 %s472_s11, 1  ;;  %s111_s29 = scalar_lea.vmem [#allocation3], %s296_s24 }
  0x11   : > { %s561_s26 = scalar_select %p42_p9, %s460_s8, %s44_s17  }
  0x12   : > { %s117_s27 = sadd.s32 %s476_s12, %s297_s25  ;;  %s121_s30 = sshll.u32 %s111_s29, 4  ;;  %s569_s30 = int_to_ptr.vmem [resolvable:$true] %s121_s30 }
  0x13   : > { %s298_s28 = sshll.u32 %s117_s27, 6  ;;  %p575_p10 = pnand %p318_p8, %p545_p5 }
  0x14   : > { %s567_s4 = scalar_lea.hbm %s653_s0, %s298_s28  ;;  %s108_s6 = scalar_lea.sflag [#allocation4], %s107_s23 }
  0x15   : > { %s384_s14 = scalar_lea.hbm %s567_s4, 64  ;;  %p386_p0 = pneg %p575_p10 }
  0x16   : > { %p385_p13 = scmp.ne.s32.totalorder %s567_s4, %s384_s14  ;;  %s389_s19 = scalar_lea.hbm %s653_s0, 256 }
  0x17   : > { %p390_p3 = scmp.lt.u32.totalorder %s567_s4, %s653_s0  ;;  %p391_p4 = scmp.lt.u32.totalorder %s389_s19, %s384_s14 }
  0x18   : > { %p387_p1 = pnand %p386_p0, %p385_p13  ;;  %p393_p6 = scmp.lt.u32.totalorder %s384_s14, %s567_s4 }
  0x19   : > { %p392_p5 = por %p391_p4, %p390_p3 }
  0x1a   : > { %p388_p2 = pneg %p387_p1 }
  0x1b   : > { %p394_p8 = por %p393_p6, %p392_p5 }
  0x1d   : > { %p395_p9 = pnand %p394_p8, %p388_p2 }
  0x1f   : > { %398 = shalt.err (!%p395_p9)
}
  0x20   : > { %s399_s23 = scalar_lea.vmem %s569_s30, 64  ;;  %s482_s24 = smov [#allocation3]  }
  0x21   : > { %p400_p13 = scmp.ne.s32.totalorder %s569_s30, %s399_s23  ;;  %s404_s25 = sshll.u32 %s482_s24, 4  ;;  %s405_s25 = int_to_ptr.vmem [resolvable:$false] %s404_s25 }
  0x22   : > { %s406_s27 = scalar_lea.vmem %s405_s25, 128  ;;  %p407_p12 = scmp.lt.s32.totalorder %s569_s30, %s405_s25 }
  0x23   : > { %p402_p1 = pnand %p400_p13, %p386_p0  ;;  %p408_p3 = scmp.lt.s32.totalorder %s406_s27, %s399_s23 }
  0x25   : > { %p403_p11 = pneg %p402_p1  ;;  %p409_p4 = por %p408_p3, %p407_p12 }
  0x27   : > { %p410_p5 = pnand %p409_p4, %p403_p11 }
  0x29   : > { %413 = shalt.err (!%p410_p5)
}
  0x2a   : > { %317 = dma.hbm_to_vmem [thread:$0]  (!%p575_p10), %s567_s4, 64, %s569_s30, %s108_s6  }
  0x2b   : > { %p658_p2 = scmp.lt.s32.totalorder %s480_s13, 5  ;;  %p659_p6 = scmp.ge.s32.totalorder %s480_s13, 1 }
  0x2d   : > { %p127_p0 = pnand %p659_p6, %p658_p2 }
  0x2e   : > { %s132_s28 = sand.u32 (!%p127_p0), 1, %s456_s7  }
  0x2f   : > { %130 = sbr.rel (%p127_p0) target bundleno = 229 (0xe5), region = 24  ;;  %s300_s29 = sshll.u32 (!%p127_p0), %s132_s28, 2 }
  0x30   : > { %s133_s2 = scalar_lea.sflag (!%p127_p0), [#allocation4], %s132_s28  ;;  %s136_s3 = scalar_lea.vmem (!%p127_p0), [#allocation3], %s300_s29 }
  0x36   : > { %447 = dma.done.wait (%p551_p7), %s133_s2, 64  }
  0x37   : > { %449 = vsyncadd (%p551_p7), %s133_s2, 4294967232  ;;  %p156_p11 = scmp.lt.s32.totalorder %s468_s10, 1  ;;  %p161_p10 = scmp.eq.s32.totalorder %s464_s9, 0 }
  0x38   : > { %v483_v0 = vmov (%p161_p10), 0.0  }
  0x39   : > { %s157_s30 = scalar_select %p156_p11, %s468_s10, 1 }
  0x3a   : > { %166 = sbr.rel (!%p161_p10) target bundleno = 65 (0x41), region = 32  ;;  %167 = vst [vmem:[#allocation2] sm:$0xf] (%p161_p10), %v483_v0  ;;  %168 = vst [vmem:[#allocation2 + $0x4] sm:$0xf] (%p161_p10), %v483_v0 }
  0x3b   : > { %s309_s4 = sshll.u32 %s157_s30, 3 }
  0x3c   : > { %s621_s14 = scalar_lea.vmem %s654_s1, %s309_s4 }
  0x41 PF: > { %s304_s20 = sshll.u32 %s468_s10, 7  ;;  %v172_v1 = vlaneseq  ;;  %p190_p7 = scmp.eq.s32.totalorder %s464_s9, 1  ;;  %v169_v2 = vld [vmem:[%s136_s3] sm:$0xf]  ;;  %v180_v5 = vld [vmem:[#allocation2] sm:$0xf] }
  0x42   : > { %s174_s17 = ssub.s32 256, %s304_s20  ;;  %v185_v7 = vld [vmem:[#allocation2 + $0x4] sm:$0xf]  ;;  %vm196_vm1 = vcmask (%p190_p7), 1043456   ;;  %vm200_vm2 = vcmask (%p190_p7), 3072  }
  0x43   : > { %v173_v3 = vand.u32 127, %v172_v1  ;;  %v175_v4 = vstv %s174_s17 }
  0x45   : > { %vm176_vm0 = vcmp.lt.s32.totalorder %v173_v3, %v175_v4  ;;  %194 = sbr.rel (!%p190_p7) target bundleno = 229 (0xe5), region = 36 }
  0x46   : > { %v179_v6 = vsel %vm176_vm0, %v169_v2, 0.0 }
  0x47   : > { %v182_v8 = vadd.f32 %v180_v5, %v179_v6  ;;  %v186_v9 = vmul.f32 %v179_v6, %v179_v6 }
  0x49   : > { %183 = vst [vmem:[#allocation2] sm:$0xf] %v182_v8  ;;  %v188_v10 = vadd.f32 %v186_v9, %v185_v7 }
  0x4b   : > { %189 = vst [vmem:[#allocation2 + $0x4] sm:$0xf] %v188_v10 }
  0x50   : > { %v195_v11 = vld [vmem:[#allocation2] sm:$0xf] }
  0x51   : > { %v197_v13 = vsel %vm196_vm1, %v195_v11, 0.0 }
  0x52   : > { %v202_v12 = vld [vmem:[#allocation2 + $0x4] sm:$0xf]  ;;  %198 = vadd.xlane.f32.xlu0 %v197_v13 }
  0x53   : > { %v203_v14 = vsel %vm196_vm1, %v202_v12, 0.0 }
  0x56   : > { %204 = vadd.xlane.f32.xlu0 %v203_v14 }
  0xdf   : > { %v199_v15 = vpop.xlane.xlu0 %198 }
  0xe0   : > { %201 = vst.msk [vmem:[%s621_s14] sm:$0xf] %vm200_vm2, %v199_v15 }
  0xe3   : > { %v205_v16 = vpop.xlane.xlu0 %204 }
  0xe4   : > { %306 = vst.msk [vmem:[%s621_s14 + $0x4] sm:$0xf] %vm200_vm2, %v205_v16 }
  0xe5 PF: > { %s14_s13 = sadd.s32 1, %s480_s13   ;;  %s660_s6 = smov %s456_s7 }
  0xe6   : > { %p11_p12 = scmp.ge.s32.totalorder %s14_s13, 6   ;;  %s661_s7 = smov %s460_s8 }
  0xe7   : > { %s662_s8 = smov %s561_s26  ;;  %s663_s9 = smov %s472_s11 }
  0xe8   : > { %s664_s10 = smov %s476_s12  ;;  %s665_s11 = smov %s668_s15 }
  0xe9   : > { %s666_s12 = smov %s672_s16  ;;  %13 = sbr.rel (!%p11_p12) target bundleno = 5 (0x5), region = 74 }
  0xf0   :  { %229 = vsyncpa [#allocation4], 1 }
  0xf1   :  { %231 = vsyncpa [#allocation4 + $0x1], 1 }

</bundles_post_ra>
